<compile_context>
chip_gen: v7x
topology: tpu7x:2x2x1
jax: 0.10.0
libtpu: 0.0.40
codegen_flags: <defaults>
</compile_context>

<pallas_src>
import jax
import jax.numpy as jnp
from jax.experimental import pallas as pl
from jax.experimental.pallas import tpu as pltpu


def _odn_kernel(xT_ref, w1T_ref, b1_ref, w2T_ref, b2_ref, w3T_ref, b3_ref,
                w4T_ref, b4_ref, o_ref):
    # Activations live as (features, tile_n): features on sublanes, batch on lanes.
    xT = xT_ref[...]                                                   # (d, tile_n)

    h = jnp.dot(w1T_ref[...], xT, preferred_element_type=jnp.float32) + b1_ref[...]
    h = jax.nn.sigmoid(h)                                              # (M, tile_n)

    h = jnp.dot(w2T_ref[...], h, preferred_element_type=jnp.float32) + b2_ref[...]
    h = jax.nn.sigmoid(h)

    h = jnp.dot(w3T_ref[...], h, preferred_element_type=jnp.float32) + b3_ref[...]
    h = jax.nn.sigmoid(h)

    # Final layer as a lane-dense (1, M) @ (M, tile_n) -> (1, tile_n) row;
    # bias (with K/2 folded in) is a single SMEM scalar.
    out = jnp.dot(w4T_ref[...], h, preferred_element_type=jnp.float32)
    o_ref[...] = (out + b4_ref[0, 0]).astype(o_ref.dtype)


def odn_forward(x, params, K, *, tile_n=None):
    """x: (N, d) float32.  Returns (N, 1) float32 == 4-layer sigmoid MLP(x) + K/2."""
    w1, b1, w2, b2, w3, b3, w4, b4 = params
    N, d = x.shape
    M = w1.shape[1]

    # Large batch tiles: per-grid-step overhead dominates this tiny network, so
    # use as few grid steps as possible (lane-aligned to 128).
    if tile_n is None:
        tile_n = 2048 if N > 2048 else max(128, ((N + 127) // 128) * 128)
    assert tile_n % 128 == 0, "tile_n must be a multiple of 128 (lane width)"

    n_pad = (-N) % tile_n
    Np = N + n_pad
    num_tiles = Np // tile_n

    # Batch on lanes: x transposed to (d, Np) (zero-pad the tail tile if needed).
    xT = x.T
    if n_pad:
        xT = jnp.pad(xT, ((0, 0), (0, n_pad)))

    # Weights transposed so the kernel computes W @ h; biases as (M, 1) columns.
    w1T, w2T, w3T = w1.T, w2.T, w3.T            # (M, d), (M, M), (M, M)
    w4T = w4.T                                   # (1, M)
    b1c = b1.reshape(M, 1)
    b2c = b2.reshape(M, 1)
    b3c = b3.reshape(M, 1)
    # Fold K/2 into the final bias and pass it through SMEM as a single scalar.
    b4_eff = (b4.reshape(1, 1) + jnp.float32(K) / 2.0).astype(jnp.float32)

    in_specs = [
        pl.BlockSpec((d, tile_n), lambda i: (0, i)),         # xT (streams with N)
        pl.BlockSpec((M, d), lambda i: (0, 0)),              # w1T (resident)
        pl.BlockSpec((M, 1), lambda i: (0, 0)),              # b1
        pl.BlockSpec((M, M), lambda i: (0, 0)),              # w2T
        pl.BlockSpec((M, 1), lambda i: (0, 0)),              # b2
        pl.BlockSpec((M, M), lambda i: (0, 0)),              # w3T
        pl.BlockSpec((M, 1), lambda i: (0, 0)),              # b3
        pl.BlockSpec((1, M), lambda i: (0, 0)),              # w4T
        pl.BlockSpec(memory_space=pltpu.MemorySpace.SMEM),   # b4 + K/2 scalar
    ]
    # Lane-dense output: one (1, tile_n) row per grid step into a (1, Np) slab.
    out_specs = pl.BlockSpec((1, tile_n), lambda i: (0, i))

    out = pl.pallas_call(
        _odn_kernel,
        out_shape=jax.ShapeDtypeStruct((1, Np), jnp.float32),
        grid_spec=pltpu.PrefetchScalarGridSpec(
            num_scalar_prefetch=0,
            grid=(num_tiles,),
            in_specs=in_specs,
            out_specs=out_specs,
        ),
        compiler_params=pltpu.CompilerParams(
            dimension_semantics=("parallel",)),
    )(xT, w1T, b1c, w2T, b2c, w3T, b3c, w4T, b4_eff)

    return out.reshape(Np, 1)[:N]


def init_odn_params(key, d, M):
    """Deterministic init mimicking PyTorch nn.Linear default (U[-1/sqrt(fan_in), 1/sqrt(fan_in)]).

    Weights are stored as (in_features, out_features), i.e. already transposed
    relative to PyTorch's (out, in), so x @ W + b == PyTorch x @ W_pt.T + b.
    """
    keys = jax.random.split(key, 8)

    def linear(kw, kb, fan_in, fan_out):
        bound = 1.0 / jnp.sqrt(fan_in)
        w = jax.random.uniform(kw, (fan_in, fan_out), jnp.float32, -bound, bound)
        b = jax.random.uniform(kb, (1, fan_out), jnp.float32, -bound, bound)
        return w, b

    w1, b1 = linear(keys[0], keys[1], d, M)
    w2, b2 = linear(keys[2], keys[3], M, M)
    w3, b3 = linear(keys[4], keys[5], M, M)
    w4, b4 = linear(keys[6], keys[7], M, 1)
    return (w1, b1, w2, b2, w3, b3, w4, b4)


def odn_reference(x, params, K):
    w1, b1, w2, b2, w3, b3, w4, b4 = params
    h = jax.nn.sigmoid(x @ w1 + b1)
    h = jax.nn.sigmoid(h @ w2 + b2)
    h = jax.nn.sigmoid(h @ w3 + b3)
    return h @ w4 + b4 + K / 2.0


if __name__ == "__main__":
    d, M, K = 8, 32, 3.0
    N = 128  # batch

    key = jax.random.PRNGKey(0)
    kx, kp = jax.random.split(key)
    x = jax.random.normal(kx, (N, d), dtype=jnp.float32)
    params = init_odn_params(kp, d, M)

    out = odn_forward(x, params, K)
    out = jax.block_until_ready(out)

    ref = odn_reference(x, params, K)
    assert out.shape == (N, 1)
    assert jnp.allclose(out, ref, atol=1e-5, rtol=1e-5), "mismatch vs reference"

    print("KERNEL_OK")
</pallas_src>

<mosaic_0001>
module attributes {stable_mosaic.version = 11 : i64} {
  func.func @_odn_kernel(%arg0: i32, %arg1: memref<8x128xf32, #tpu.memory_space<vmem>>, %arg2: memref<32x8xf32, #tpu.memory_space<vmem>>, %arg3: memref<32x1xf32, #tpu.memory_space<vmem>>, %arg4: memref<32x32xf32, #tpu.memory_space<vmem>>, %arg5: memref<32x1xf32, #tpu.memory_space<vmem>>, %arg6: memref<32x32xf32, #tpu.memory_space<vmem>>, %arg7: memref<32x1xf32, #tpu.memory_space<vmem>>, %arg8: memref<1x32xf32, #tpu.memory_space<vmem>>, %arg9: memref<1x1xf32, #tpu.memory_space<smem>>, %arg10: memref<1x128xf32, #tpu.memory_space<vmem>>) attributes {dimension_semantics = [#tpu.dimension_semantics<parallel>], iteration_bounds = array<i64: 1>, scalar_prefetch = 0 : i64, scratch_operands = 0 : i64, tpu.core_type = #tpu.core_type<tc>, window_params = [{transform_indices = @transform_0, window_bounds = array<i64: 8, 128>}, {pipeline_mode = #tpu.pipeline_mode<synchronous>, transform_indices = @transform_1, window_bounds = array<i64: 32, 8>}, {pipeline_mode = #tpu.pipeline_mode<synchronous>, transform_indices = @transform_2, window_bounds = array<i64: 32, 1>}, {pipeline_mode = #tpu.pipeline_mode<synchronous>, transform_indices = @transform_3, window_bounds = array<i64: 32, 32>}, {pipeline_mode = #tpu.pipeline_mode<synchronous>, transform_indices = @transform_4, window_bounds = array<i64: 32, 1>}, {pipeline_mode = #tpu.pipeline_mode<synchronous>, transform_indices = @transform_5, window_bounds = array<i64: 32, 32>}, {pipeline_mode = #tpu.pipeline_mode<synchronous>, transform_indices = @transform_6, window_bounds = array<i64: 32, 1>}, {pipeline_mode = #tpu.pipeline_mode<synchronous>, transform_indices = @transform_7, window_bounds = array<i64: 1, 32>}, {transform_indices = @transform_8, window_bounds = array<i64: 1, 1>}, {transform_indices = @transform_9, window_bounds = array<i64: 1, 128>}]} {
    %c0 = arith.constant 0 : index
    %c0_0 = arith.constant 0 : index
    %0 = vector.load %arg1[%c0, %c0_0] : memref<8x128xf32, #tpu.memory_space<vmem>>, vector<8x128xf32>
    %c0_1 = arith.constant 0 : index
    %c0_2 = arith.constant 0 : index
    %1 = vector.load %arg2[%c0_1, %c0_2] : memref<32x8xf32, #tpu.memory_space<vmem>>, vector<32x8xf32>
    %cst = arith.constant dense<0.000000e+00> : vector<32x128xf32>
    %2 = tpu.matmul %1, %0, %cst {dimension_numbers = #tpu.dot_dimension_numbers<[1], [0], [0], [1], [0, 0, 1, 1], [], []>} : vector<32x8xf32>, vector<8x128xf32>, vector<32x128xf32> -> vector<32x128xf32>
    %c0_3 = arith.constant 0 : index
    %c0_4 = arith.constant 0 : index
    %3 = vector.load %arg3[%c0_3, %c0_4] : memref<32x1xf32, #tpu.memory_space<vmem>>, vector<32x1xf32>
    %4 = vector.broadcast %3 : vector<32x1xf32> to vector<32x128xf32>
    %5 = arith.addf %2, %4 : vector<32x128xf32>
    %6 = arith.negf %5 : vector<32x128xf32>
    %7 = math.exp %6 : vector<32x128xf32>
    %cst_5 = arith.constant 1.000000e+00 : f32
    %8 = vector.broadcast %cst_5 : f32 to vector<32x128xf32>
    %9 = arith.addf %8, %7 : vector<32x128xf32>
    %10 = arith.divf %8, %9 : vector<32x128xf32>
    %c0_6 = arith.constant 0 : index
    %c0_7 = arith.constant 0 : index
    %11 = vector.load %arg4[%c0_6, %c0_7] : memref<32x32xf32, #tpu.memory_space<vmem>>, vector<32x32xf32>
    %cst_8 = arith.constant dense<0.000000e+00> : vector<32x128xf32>
    %12 = tpu.matmul %11, %10, %cst_8 {dimension_numbers = #tpu.dot_dimension_numbers<[1], [0], [0], [1], [0, 0, 1, 1], [], []>} : vector<32x32xf32>, vector<32x128xf32>, vector<32x128xf32> -> vector<32x128xf32>
    %c0_9 = arith.constant 0 : index
    %c0_10 = arith.constant 0 : index
    %13 = vector.load %arg5[%c0_9, %c0_10] : memref<32x1xf32, #tpu.memory_space<vmem>>, vector<32x1xf32>
    %14 = vector.broadcast %13 : vector<32x1xf32> to vector<32x128xf32>
    %15 = arith.addf %12, %14 : vector<32x128xf32>
    %16 = arith.negf %15 : vector<32x128xf32>
    %17 = math.exp %16 : vector<32x128xf32>
    %cst_11 = arith.constant 1.000000e+00 : f32
    %18 = vector.broadcast %cst_11 : f32 to vector<32x128xf32>
    %19 = arith.addf %18, %17 : vector<32x128xf32>
    %20 = arith.divf %18, %19 : vector<32x128xf32>
    %c0_12 = arith.constant 0 : index
    %c0_13 = arith.constant 0 : index
    %21 = vector.load %arg6[%c0_12, %c0_13] : memref<32x32xf32, #tpu.memory_space<vmem>>, vector<32x32xf32>
    %cst_14 = arith.constant dense<0.000000e+00> : vector<32x128xf32>
    %22 = tpu.matmul %21, %20, %cst_14 {dimension_numbers = #tpu.dot_dimension_numbers<[1], [0], [0], [1], [0, 0, 1, 1], [], []>} : vector<32x32xf32>, vector<32x128xf32>, vector<32x128xf32> -> vector<32x128xf32>
    %c0_15 = arith.constant 0 : index
    %c0_16 = arith.constant 0 : index
    %23 = vector.load %arg7[%c0_15, %c0_16] : memref<32x1xf32, #tpu.memory_space<vmem>>, vector<32x1xf32>
    %24 = vector.broadcast %23 : vector<32x1xf32> to vector<32x128xf32>
    %25 = arith.addf %22, %24 : vector<32x128xf32>
    %26 = arith.negf %25 : vector<32x128xf32>
    %27 = math.exp %26 : vector<32x128xf32>
    %cst_17 = arith.constant 1.000000e+00 : f32
    %28 = vector.broadcast %cst_17 : f32 to vector<32x128xf32>
    %29 = arith.addf %28, %27 : vector<32x128xf32>
    %30 = arith.divf %28, %29 : vector<32x128xf32>
    %c0_18 = arith.constant 0 : index
    %c0_19 = arith.constant 0 : index
    %31 = vector.load %arg8[%c0_18, %c0_19] : memref<1x32xf32, #tpu.memory_space<vmem>>, vector<1x32xf32>
    %cst_20 = arith.constant dense<0.000000e+00> : vector<1x128xf32>
    %32 = tpu.matmul %31, %30, %cst_20 {dimension_numbers = #tpu.dot_dimension_numbers<[1], [0], [0], [1], [0, 0, 1, 1], [], []>} : vector<1x32xf32>, vector<32x128xf32>, vector<1x128xf32> -> vector<1x128xf32>
    %c0_21 = arith.constant 0 : index
    %c0_22 = arith.constant 0 : index
    %33 = memref.load %arg9[%c0_21, %c0_22] : memref<1x1xf32, #tpu.memory_space<smem>>
    %34 = vector.broadcast %33 : f32 to vector<1x128xf32>
    %35 = arith.addf %32, %34 : vector<1x128xf32>
    %c0_23 = arith.constant 0 : index
    %c0_24 = arith.constant 0 : index
    %36 = vector.load %arg10[%c0_23, %c0_24] : memref<1x128xf32, #tpu.memory_space<vmem>>, vector<1x128xf32>
    tpu.vector_store %arg10[%c0_23, %c0_24], %35 {strides = array<i32>} : memref<1x128xf32, #tpu.memory_space<vmem>>, vector<1x128xf32>,
    return
  }
  func.func @transform_0(%arg0: i32) -> (i32, i32) {
    %c0_i32 = arith.constant 0 : i32
    %c0_i32_0 = arith.constant 0 : i32
    return %c0_i32, %arg0 : i32, i32
  }
  func.func @transform_1(%arg0: i32) -> (i32, i32) {
    %c0_i32 = arith.constant 0 : i32
    %c0_i32_0 = arith.constant 0 : i32
    %c0_i32_1 = arith.constant 0 : i32
    return %c0_i32, %c0_i32_0 : i32, i32
  }
  func.func @transform_2(%arg0: i32) -> (i32, i32) {
    %c0_i32 = arith.constant 0 : i32
    %c0_i32_0 = arith.constant 0 : i32
    %c0_i32_1 = arith.constant 0 : i32
    return %c0_i32, %c0_i32_0 : i32, i32
  }
  func.func @transform_3(%arg0: i32) -> (i32, i32) {
    %c0_i32 = arith.constant 0 : i32
    %c0_i32_0 = arith.constant 0 : i32
    %c0_i32_1 = arith.constant 0 : i32
    return %c0_i32, %c0_i32_0 : i32, i32
  }
  func.func @transform_4(%arg0: i32) -> (i32, i32) {
    %c0_i32 = arith.constant 0 : i32
    %c0_i32_0 = arith.constant 0 : i32
    %c0_i32_1 = arith.constant 0 : i32
    return %c0_i32, %c0_i32_0 : i32, i32
  }
  func.func @transform_5(%arg0: i32) -> (i32, i32) {
    %c0_i32 = arith.constant 0 : i32
    %c0_i32_0 = arith.constant 0 : i32
    %c0_i32_1 = arith.constant 0 : i32
    return %c0_i32, %c0_i32_0 : i32, i32
  }
  func.func @transform_6(%arg0: i32) -> (i32, i32) {
    %c0_i32 = arith.constant 0 : i32
    %c0_i32_0 = arith.constant 0 : i32
    %c0_i32_1 = arith.constant 0 : i32
    return %c0_i32, %c0_i32_0 : i32, i32
  }
  func.func @transform_7(%arg0: i32) -> (i32, i32) {
    %c0_i32 = arith.constant 0 : i32
    %c0_i32_0 = arith.constant 0 : i32
    %c0_i32_1 = arith.constant 0 : i32
    return %c0_i32, %c0_i32_0 : i32, i32
  }
  func.func @transform_8(%arg0: i32) -> (i32, i32) {
    %c0_i32 = arith.constant 0 : i32
    %c0_i32_0 = arith.constant 0 : i32
    %c0_i32_1 = arith.constant 0 : i32
    return %c0_i32, %c0_i32_0 : i32, i32
  }
  func.func @transform_9(%arg0: i32) -> (i32, i32) {
    %c0_i32 = arith.constant 0 : i32
    %c0_i32_0 = arith.constant 0 : i32
    return %c0_i32, %arg0 : i32, i32
  }
}

</mosaic_0001>

<bundles_post_ra>
// kernel: tpu_custom_call.1
= control target key start
LH: loop header
LB: loop body
LE: loop exit
PB: predicated region body
PF: predicated region fallthrough
CT: control target
= control target key end

     0   :  { %vm63_vm0 = vcmask 64512   ;;  %v774_v5 = vmov 0   ;;  %s935_s0 = inlined_call_operand.vmem [shape: f32[8,128], index: 0, kind: input, shape index: {}]   ;;  %s936_s1 = inlined_call_operand.vmem [shape: f32[32,8], index: 1, kind: input, shape index: {}]   ;;  %s937_s2 = inlined_call_operand.vmem [shape: f32[32,1], index: 2, kind: input, shape index: {}]   ;;  %s938_s3 = inlined_call_operand.vmem [shape: f32[32,32], index: 3, kind: input, shape index: {}]   ;;  %s939_s4 = inlined_call_operand.vmem [shape: f32[32,1], index: 4, kind: input, shape index: {}]   ;;  %s940_s5 = inlined_call_operand.vmem [shape: f32[32,32], index: 5, kind: input, shape index: {}]   ;;  %s941_s6 = inlined_call_operand.vmem [shape: f32[32,1], index: 6, kind: input, shape index: {}]   ;;  %s942_s7 = inlined_call_operand.vmem [shape: f32[1,32], index: 7, kind: input, shape index: {}]   ;;  %s943_s8 = inlined_call_operand.<no memory space> [shape: f32[1,1], index: 8, kind: input, shape index: {}]   ;;  %s944_s9 = inlined_call_operand.hbm [shape: f32[1,128], index: 9, kind: output, shape index: {}]  }
   0x1   :  { %v34_v0 = vld [vmem:[%s935_s0] sm:$0xff]  ;;  %v36_v2 = vld [vmem:[%s936_s1 + $0x8] sm:$0xff]  ;;  %v37_v3 = vld [vmem:[%s936_s1 + $0x10] sm:$0xff]  ;;  %700 = vset.pattern.permute.xlu0 %v774_v5  ;;  %701 = vset.pattern.permute.xlu1 %v774_v5 }
   0x2   :  { %v35_v1 = vld [vmem:[%s936_s1] sm:$0xff]  ;;  %626 = vmatprep.subr.mxu0 %v34_v0  ;;  %v41_v6 = vld [vmem:[%s937_s2 + $0x10] sm:$0xff]  ;;  %v38_v7 = vld [vmem:[%s936_s1 + $0x18] sm:$0xff] }
   0x3   :  { %628 = vmatprep.mubr.msk.f32.mxu0 %vm63_vm0, %v35_v1  ;;  %v39_v4 = vld [vmem:[%s937_s2] sm:$0xff]  ;;  %627 = vmatpush3.msra.mxu0 %v34_v0  ;;  %v40_v8 = vld [vmem:[%s937_s2 + $0x8] sm:$0xff] }
   0x4   :  { %629 = vmatmul.mubr.msk.f32.vlgmr.msra.gmra.mrb[0].mxu0 %vm63_vm0, %v36_v2  ;;  %45 = vperm.xlu0 %700, %v39_v4  }
   0x5   :  { %631 = vmatprep.mubr.msk.f32.mxu0 %vm63_vm0, %v37_v3  ;;  %55 = vperm.xlu1 %701, %v41_v6  }
   0x6   :  { %15 = vsyncpa [#allocation4], 0  ;;  %v42_v9 = vld [vmem:[%s937_s2 + $0x18] sm:$0xff]  ;;  %v189_v10 = vld [vmem:[%s939_s4] sm:$0xff]  ;;  %vm213_vm1 = vcmask 261120   ;;  %vm776_vm2 = vmmov 0  }
   0x7   :  { %v190_v11 = vld [vmem:[%s939_s4 + $0x8] sm:$0xff]  ;;  %v191_v12 = vld [vmem:[%s939_s4 + $0x10] sm:$0xff]  ;;  %v192_v13 = vld [vmem:[%s939_s4 + $0x18] sm:$0xff]  ;;  %s778_s11 = smov [#allocation3]  }
   0x8   :  { %632 = vmatmul.mubr.msk.f32.gmra.mrb[2].mxu0 %vm63_vm0, %v38_v7  ;;  %50 = vperm.xlu0 %700, %v40_v8   ;;  %v339_v14 = vld [vmem:[%s941_s6] sm:$0xff]  ;;  %v340_v15 = vld [vmem:[%s941_s6 + $0x8] sm:$0xff]  ;;  %v341_v16 = vld [vmem:[%s941_s6 + $0x10] sm:$0xff]  ;;  %s567_s12 = sshll.u32 %s778_s11, 4  ;;  %s568_s12 = int_to_ptr.vmem [resolvable:$true] %s567_s12 }
   0x9   :  { %60 = vperm.xlu1 %701, %v42_v9   ;;  %v342_v17 = vld [vmem:[%s941_s6 + $0x18] sm:$0xff]  ;;  %v185_v18 = vld [vmem:[%s938_s3] sm:$0xff]  ;;  %v186_v49 = vld [vmem:[%s938_s3 + $0x8] sm:$0xff]  ;;  %s750_s13 = scalar_lea.vmem %s568_s12, 16  ;;  %s754_s14 = scalar_lea.vmem %s568_s12, 32 }
   0xa   :  { %642 = vmatprep.mubr.msk.f32.mxu1 %vm213_vm1, %v185_v18  ;;  %v187_v50 = vld [vmem:[%s938_s3 + $0x10] sm:$0xff]  ;;  %v188_v51 = vld [vmem:[%s938_s3 + $0x18] sm:$0xff]  ;;  %v335_v52 = vld [vmem:[%s940_s5] sm:$0xff]  ;;  %p751_p0 = scmp.ne.s32.totalorder %s568_s12, %s750_s13  ;;  %p755_p1 = scmp.lt.s32.totalorder %s568_s12, %s568_s12 }
   0xb   :  { %656 = vmatprep.mubr.msk.f32.mxu0 %vm213_vm1, %v335_v52  ;;  %p756_p2 = scmp.lt.s32.totalorder %s754_s14, %s750_s13 }
   0xc   :  { %195 = vperm.xlu0 %700, %v189_v10  }
   0xd   :  { %200 = vperm.xlu1 %701, %v190_v11   ;;  %p757_p3 = por %p756_p2, %p755_p1 }
   0xf   :  { %p758_p4 = pnand %p757_p3, %p751_p0 }
  0x10   :  { %205 = vperm.xlu0 %700, %v191_v12  }
  0x11   :  { %210 = vperm.xlu1 %701, %v192_v13  }
  0x14   :  { %345 = vperm.xlu0 %700, %v339_v14  }
  0x15   :  { %350 = vperm.xlu1 %701, %v340_v15  }
  0x18   :  { %355 = vperm.xlu0 %700, %v341_v16  }
  0x19   :  { %360 = vperm.xlu1 %701, %v342_v17  }
  0x83   :  { %v46_v19 = vpop.permute.xlu0 %45 }
  0x84   :  { %v56_v20 = vpop.permute.xlu1 %55 }
  0x87   :  { %v51_v21 = vpop.permute.xlu0 %50 }
  0x88   :  { %v61_v27 = vpop.permute.xlu1 %60 }
  0x8b   :  { %v196_v54 = vpop.permute.xlu0 %195 }
  0x8c   :  { %v201_v53 = vpop.permute.xlu1 %200 }
  0x8f   :  { %v206_v63 = vpop.permute.xlu0 %205 }
  0x90   :  { %v211_v60 = vpop.permute.xlu1 %210 }
  0xd7   :  { %v630_v22 = vpop.f32.mrb[0].mxu0 }
  0xd8   :  { %v148_v23 = vadd.f32 %v630_v22, %v51_v21  ;;  %v142_v24 = vpop.f32.mrb[1].mxu0  ;;  %v338_v21 = vld [vmem:[%s940_s5 + $0x18] sm:$0xff]  ;;  %v775_v22 = vmov 0.0|0.0  }
  0xd9   :  { %v143_v25 = vadd.f32 %v142_v24, %v46_v19  ;;  %v336_v19 = vld [vmem:[%s940_s5 + $0x8] sm:$0xff]  ;;  %v351_v24 = vpop.permute.xlu1 %350 }
  0xda   :  { %v580_v26 = vmul.f32 -1.442695, %v148_v23  ;;  %v777_v23 = vmov 0.0  }
  0xdb   :  { %v579_v28 = vmul.f32 -1.442695, %v143_v25  ;;  %v633_v29 = vpop.f32.mrb[2].mxu0  ;;  %v346_v25 = vpop.permute.xlu0 %345 }
  0xdc   :  { %702 = vpow2.f32 %v580_v26  ;;  %v158_v30 = vadd.f32 %v633_v29, %v61_v27  ;;  %v152_v31 = vpop.f32.mrb[3].mxu0 }
  0xdd   :  { %704 = vpow2.f32 %v579_v28  ;;  %v153_v32 = vadd.f32 %v152_v31, %v56_v20  ;;  %v337_v20 = vld [vmem:[%s940_s5 + $0x10] sm:$0xff]  ;;  %v361_v31 = vpop.permute.xlu1 %360 }
  0xde   :  { %v582_v33 = vmul.f32 -1.442695, %v158_v30 }
  0xdf   :  { %v581_v34 = vmul.f32 -1.442695, %v153_v32 }
  0xe0   :  { %706 = vpow2.f32 %v582_v33 }
  0xe1   :  { %708 = vpow2.f32 %v581_v34  ;;  %v356_v34 = vpop.permute.xlu0 %355 }
  0xe6   :  { %v703_v35 = vpop.eup %702 }
  0xe7   :  { %v705_v36 = vpop.eup %704  ;;  %v174_v37 = vadd.f32 1.0, %v703_v35 }
  0xe8   :  { %v173_v38 = vadd.f32 1.0, %v705_v36 }
  0xe9   :  { %710 = vrcp.f32 %v174_v37 }
  0xea   :  { %v707_v39 = vpop.eup %706  ;;  %712 = vrcp.f32 %v173_v38 }
  0xeb   :  { %v709_v40 = vpop.eup %708  ;;  %v176_v41 = vadd.f32 1.0, %v707_v39 }
  0xec   :  { %v175_v42 = vadd.f32 1.0, %v709_v40 }
  0xed   :  { %714 = vrcp.f32 %v176_v41 }
  0xee   :  { %716 = vrcp.f32 %v175_v42 }
  0xf3   :  { %v711_v43 = vpop.eup %710 }
  0xf4   :  { %v713_v44 = vpop.eup %712 }
  0xf5   :  { %v673_v45 = vpack.c.bf16 %v711_v43, %v713_v44 }
  0xf7   :  { %v715_v46 = vpop.eup %714  ;;  %674 = vmatprep.subr.bf16.mxu1 %v673_v45 }
  0xf8   :  { %v717_v47 = vpop.eup %716  ;;  %676 = vmatpush3.bf16.msra.mxu1 %v673_v45 }
  0xf9   :  { %v677_v48 = vpack.c.bf16 %v715_v46, %v717_v47 }
  0xfb   :  { %678 = vmatprep.subr.bf16.mxu1 %v677_v48 }
  0xfc   :  { %680 = vmatpush3.bf16.msra.mxu1 %v677_v48 }
  0xfd   :  { %689 = vmatprep.subr.bf16.mxu1 %v775_v22 }
  0xff   :  { %643 = vmatmul.mubr.msk.f32.vlgmr.msra.gmra.mrb[0].mxu1 %vm213_vm1, %v186_v49 }
 0x100   :  { %645 = vmatprep.mubr.msk.f32.mxu1 %vm213_vm1, %v187_v50 }
 0x103   :  { %646 = vmatmul.mubr.msk.f32.gmra.mrb[2].mxu1 %vm213_vm1, %v188_v51 }
 0x104   :  { %670 = vmatprep.mubr.msk.f32.mxu1 %vm776_vm2, %v777_v23 }
 0x1d2   :  { %v644_v55 = vpop.f32.mrb[0].mxu1 }
 0x1d3   :  { %v298_v56 = vadd.f32 %v644_v55, %v201_v53  ;;  %v292_v57 = vpop.f32.mrb[1].mxu1  ;;  %v486_v55 = vstv %s943_s8 }
 0x1d4   :  { %v293_v58 = vadd.f32 %v292_v57, %v196_v54  ;;  %v484_v54 = vld [vmem:[%s942_s7] sm:$0x1] }
 0x1d5   :  { %v588_v59 = vmul.f32 -1.442695, %v298_v56 }
 0x1d6   :  { %v587_v61 = vmul.f32 -1.442695, %v293_v58  ;;  %v647_v62 = vpop.f32.mrb[2].mxu1 }
 0x1d7   :  { %718 = vpow2.f32 %v588_v59  ;;  %v308_v0 = vadd.f32 %v647_v62, %v211_v60  ;;  %v302_v1 = vpop.f32.mrb[3].mxu1 }
 0x1d8   :  { %720 = vpow2.f32 %v587_v61  ;;  %v303_v2 = vadd.f32 %v302_v1, %v206_v63 }
 0x1d9   :  { %v590_v3 = vmul.f32 -1.442695, %v308_v0 }
 0x1da   :  { %v589_v4 = vmul.f32 -1.442695, %v303_v2 }
 0x1db   :  { %722 = vpow2.f32 %v590_v3 }
 0x1dc   :  { %724 = vpow2.f32 %v589_v4 }
 0x1e1   :  { %v719_v5 = vpop.eup %718 }
 0x1e2   :  { %v721_v6 = vpop.eup %720  ;;  %v324_v7 = vadd.f32 1.0, %v719_v5 }
 0x1e3   :  { %v323_v8 = vadd.f32 1.0, %v721_v6 }
 0x1e4   :  { %726 = vrcp.f32 %v324_v7 }
 0x1e5   :  { %v723_v9 = vpop.eup %722  ;;  %728 = vrcp.f32 %v323_v8 }
 0x1e6   :  { %v725_v10 = vpop.eup %724  ;;  %v326_v11 = vadd.f32 1.0, %v723_v9 }
 0x1e7   :  { %v325_v12 = vadd.f32 1.0, %v725_v10 }
 0x1e8   :  { %730 = vrcp.f32 %v326_v11 }
 0x1e9   :  { %732 = vrcp.f32 %v325_v12 }
 0x1ee   :  { %v727_v13 = vpop.eup %726 }
 0x1ef   :  { %v729_v14 = vpop.eup %728 }
 0x1f0   :  { %v681_v15 = vpack.c.bf16 %v727_v13, %v729_v14 }
 0x1f2   :  { %v731_v16 = vpop.eup %730  ;;  %682 = vmatprep.subr.bf16.mxu0 %v681_v15 }
 0x1f3   :  { %v733_v17 = vpop.eup %732  ;;  %684 = vmatpush3.bf16.msra.mxu0 %v681_v15 }
 0x1f4   :  { %v685_v18 = vpack.c.bf16 %v731_v16, %v733_v17 }
 0x1f6   :  { %686 = vmatprep.subr.bf16.mxu0 %v685_v18 }
 0x1f7   :  { %688 = vmatpush3.bf16.msra.mxu0 %v685_v18 }
 0x1fa   :  { %657 = vmatmul.mubr.msk.f32.vlgmr.msra.gmra.mrb[4].mxu0 %vm213_vm1, %v336_v19 }
 0x1fb   :  { %659 = vmatprep.mubr.msk.f32.mxu0 %vm213_vm1, %v337_v20 }
 0x1fe   :  { %660 = vmatmul.mubr.msk.f32.gmra.mrb[6].mxu0 %vm213_vm1, %v338_v21 }
 0x2cd   :  { %v658_v26 = vpop.f32.mrb[4].mxu0 }
 0x2ce   :  { %v447_v27 = vadd.f32 %v658_v26, %v351_v24  ;;  %v441_v28 = vpop.f32.mrb[5].mxu0 }
 0x2cf   :  { %v442_v29 = vadd.f32 %v441_v28, %v346_v25 }
 0x2d0   :  { %v596_v30 = vmul.f32 -1.442695, %v447_v27 }
 0x2d1   :  { %v595_v32 = vmul.f32 -1.442695, %v442_v29  ;;  %v661_v33 = vpop.f32.mrb[6].mxu0 }
 0x2d2   :  { %734 = vpow2.f32 %v596_v30  ;;  %v457_v35 = vadd.f32 %v661_v33, %v361_v31  ;;  %v451_v36 = vpop.f32.mrb[7].mxu0 }
 0x2d3   :  { %736 = vpow2.f32 %v595_v32  ;;  %v452_v37 = vadd.f32 %v451_v36, %v356_v34 }
 0x2d4   :  { %v598_v38 = vmul.f32 -1.442695, %v457_v35 }
 0x2d5   :  { %v597_v39 = vmul.f32 -1.442695, %v452_v37 }
 0x2d6   :  { %738 = vpow2.f32 %v598_v38 }
 0x2d7   :  { %740 = vpow2.f32 %v597_v39 }
 0x2dc   :  { %v735_v40 = vpop.eup %734 }
 0x2dd   :  { %v737_v41 = vpop.eup %736  ;;  %v473_v42 = vadd.f32 1.0, %v735_v40 }
 0x2de   :  { %v472_v43 = vadd.f32 1.0, %v737_v41 }
 0x2df   :  { %742 = vrcp.f32 %v473_v42 }
 0x2e0   :  { %v739_v44 = vpop.eup %738  ;;  %744 = vrcp.f32 %v472_v43 }
 0x2e1   :  { %v741_v45 = vpop.eup %740  ;;  %v475_v46 = vadd.f32 1.0, %v739_v44 }
 0x2e2   :  { %v474_v47 = vadd.f32 1.0, %v741_v45 }
 0x2e3   :  { %746 = vrcp.f32 %v475_v46 }
 0x2e4   :  { %748 = vrcp.f32 %v474_v47 }
 0x2e9   :  { %v743_v48 = vpop.eup %742 }
 0x2ea   :  { %v745_v49 = vpop.eup %744 }
 0x2eb   :  { %v690_v50 = vpack.c.bf16 %v743_v48, %v745_v49 }
 0x2ed   :  { %v747_v51 = vpop.eup %746  ;;  %691 = vmatpush3.bf16.msra.mxu1 %v690_v50 }
 0x2ee   :  { %v749_v52 = vpop.eup %748  ;;  %692 = vmatprep.subr.bf16.mxu1 %v775_v22 }
 0x2ef   :  { %v693_v53 = vpack.c.bf16 %v747_v51, %v749_v52 }
 0x2f1   :  { %694 = vmatpush3.bf16.msra.mxu1 %v693_v53 }
 0x2f4   :  { %671 = vmatmul.mubr.msk.f32.vlgmr.msra.gmra.mrb[4].mxu1 %vm213_vm1, %v484_v54 }
 0x3c7   :  { %v556_v56 = vpop.f32.mrb[4].mxu1 }
 0x3c8   :  { %v557_v57 = vadd.f32 %v556_v56, %v486_v55  ;;  %v672_v58 = vpop.f32.mrb[5].mxu1 }
 0x3ca   :  { %560 = vst [vmem:[#allocation3] sm:$0x1] %v557_v57 }
 0x3cb   :  { %761 = shalt.err (!%p758_p4)
}
 0x3cc   :  { %s762_s16 = scalar_lea.hbm %s944_s9, 16 }
 0x3cd   :  { %p763_p5 = scmp.ne.s32.totalorder %s944_s9, %s762_s16  ;;  %p766_p6 = scmp.lt.u32.totalorder %s762_s16, %s944_s9 }
 0x3cf   :  { %p768_p7 = pnand %p766_p6, %p763_p5 }
 0x3d1   :  { %771 = shalt.err (!%p768_p7)
}
 0x3d2   :  { %570 = dma.vmem_to_hbm [thread:$0]  %s568_s12, 16, %s944_s9, [#allocation4]  }
 0x3d3   :  { %772 = dma.done.wait [#allocation4], 16  }
 0x3d4   :  { %773 = vsyncadd [#allocation4], 4294967280 }
 0x3d5   :  { %574 = vsyncpa [#allocation4], 1 }

</bundles_post_ra>
